<compile_context>
chip_gen: v7x
topology: tpu7x:2x2x1
jax: 0.10.0
libtpu: 0.0.40
codegen_flags: <defaults>
</compile_context>

<pallas_src>
import functools

import jax
import jax.numpy as jnp
from jax import lax
from jax.experimental import pallas as pl
from jax.experimental.pallas import tpu as pltpu


def _convbnrelu_kernel(x_ref, w_ref, scale_ref, bias_ref, o_ref,
                       pad_ref, col_ref, *, H, W, Wp, Lp, CinT):
    """One grid step = one (batch, out-frame): fused 3x3 conv + BN(eval) + ReLU.

    x_ref:     (Cin, T, H, W) f32   -- raw NCDHW window (depth window = T frames)
    w_ref:     (Cout, 9*CinT) bf16  -- weights, K index = (tap, cin, t)
    scale_ref: (Cout, 1) f32        -- folded BN scale  gamma / sqrt(var+eps)
    bias_ref:  (Cout, 1) f32        -- folded BN bias   beta - mean*scale
    o_ref:     (Cout, Lp) f32       -- lane-dense output slab, Lp = ceil(H*Wp/128)*128
    pad_ref:   (CinT, Npad) bf16    -- scratch: flat zero-padded H x Wp plane
    col_ref:   (9*CinT, Lp) bf16    -- scratch: im2col operand
    """
    # ---- halo pad + flatten + bf16 cast into the flat plane scratch --------
    pad_ref[...] = jnp.zeros_like(pad_ref)            # zero halo rows/cols + tail
    xc = x_ref[...].astype(jnp.bfloat16).reshape(CinT, H, W)
    for h in range(H):                                # row h -> flat offset (h+1)*Wp+1
        pad_ref[:, pl.ds((h + 1) * Wp + 1, W)] = xc[:, h, :]

    # ---- im2col: stack the 9 lane-shifted views along the K (sublane) axis --
    for dy in range(3):
        for dx in range(3):
            tap = dy * 3 + dx
            col_ref[pl.ds(tap * CinT, CinT), :] = pad_ref[:, pl.ds(dy * Wp + dx, Lp)]

    # ---- single K=9*CinT MXU matmul, fused BN (eval) + ReLU ------------------
    acc = jnp.dot(w_ref[...], col_ref[...], preferred_element_type=jnp.float32)
    out = jnp.maximum(acc * scale_ref[...] + bias_ref[...], 0.0)
    # TODO(synk): emit bf16 here if the consumer tolerates it (halves output
    # writeback, the dominant HBM term); kept f32 to preserve module dtype.
    o_ref[...] = out.astype(o_ref.dtype)


def conv_block_forward(x, weight, gamma, beta, running_mean, running_var,
                       *, temporal_size=1, eps=1e-5):
    """x: (N, Cin, D, H, W) f32, weight: (Cout, Cin, T, 3, 3) f32.
    Returns (N, Cout, D_out, H, W) f32 with D_out = (D - T) // T + 1."""
    N, Cin, D, H, W = x.shape
    Cout = weight.shape[0]
    T = temporal_size
    if weight.shape != (Cout, Cin, T, 3, 3):
        raise ValueError(f"weight shape {weight.shape} != (Cout, Cin, T={T}, 3, 3)")
    if D < T:
        raise ValueError(f"need D >= temporal_size, got D={D}, T={T}")

    D_out = (D - T) // T + 1          # matches PyTorch floor behaviour
    CinT = Cin * T
    K9 = 9 * CinT
    Wp = W + 2
    L = H * Wp                        # valid lane extent of one output slab
    Lp = ((L + 127) // 128) * 128     # 128-aligned lane-dense slab width
    Npad = 2 * Wp + 2 + Lp            # flat padded plane + tail so every tap window fits

    # ---- weights: (Cout, Cin, T, 3, 3) -> (Cout, 9*CinT), bf16 ---------------
    # K flat index = ((dy*3+dx)*Cin + cin)*T + t  (matches the in-kernel col order)
    w2 = jnp.transpose(weight, (0, 3, 4, 1, 2)).reshape(Cout, K9).astype(jnp.bfloat16)

    # ---- fold BatchNorm (eval / running stats) into f32 scale & bias --------
    inv_std = lax.rsqrt(running_var.astype(jnp.float32) + eps)
    scale = (gamma * inv_std).reshape(Cout, 1).astype(jnp.float32)
    bias = (beta - running_mean * gamma * inv_std).reshape(Cout, 1).astype(jnp.float32)

    # ---- VMEM budget from the actual blocks (double-buffered ins/outs) ------
    xblk = Cin * T * H * W * 4
    oblk = Cout * Lp * 4
    wblk = Cout * K9 * 2 + 2 * Cout * 4
    scratch = CinT * Npad * 2 + K9 * Lp * 2
    vmem_needed = 2 * (xblk + oblk + wblk) + scratch
    vmem_limit = int(min(max(2 * vmem_needed + (4 << 20), 16 << 20), 48 << 20))

    kernel = functools.partial(_convbnrelu_kernel,
                               H=H, W=W, Wp=Wp, Lp=Lp, CinT=CinT)
    out = pl.pallas_call(
        kernel,
        out_shape=jax.ShapeDtypeStruct((N, Cout, D_out * Lp), jnp.float32),
        grid_spec=pltpu.PrefetchScalarGridSpec(
            num_scalar_prefetch=0,
            grid=(N, D_out),
            in_specs=[
                # raw NCDHW input: depth window of T frames at offset d*T
                pl.BlockSpec((None, Cin, T, H, W), lambda n, d: (n, 0, d, 0, 0)),
                # grid-invariant weights / folded BN affine (tiny)
                pl.BlockSpec((Cout, K9), lambda n, d: (0, 0)),
                pl.BlockSpec((Cout, 1), lambda n, d: (0, 0)),
                pl.BlockSpec((Cout, 1), lambda n, d: (0, 0)),
            ],
            out_specs=pl.BlockSpec((None, Cout, Lp), lambda n, d: (n, 0, d)),
            scratch_shapes=[
                pltpu.VMEM((CinT, Npad), jnp.bfloat16),
                pltpu.VMEM((K9, Lp), jnp.bfloat16),
            ],
        ),
        compiler_params=pltpu.CompilerParams(
            dimension_semantics=("parallel", "parallel"),
            vmem_limit_bytes=vmem_limit,
        ),
    )(x, w2, scale, bias)

    # ---- drop the Lp lane padding + 2 halo columns per row (NO transpose) ---
    out = out.reshape(N, Cout, D_out, Lp)[:, :, :, :L]
    out = out.reshape(N, Cout, D_out, H, Wp)[..., :W]
    return out


def _reference(x, weight, gamma, beta, running_mean, running_var,
               *, temporal_size=1, eps=1e-5):
    """Plain-JAX reference (3D conv + eval BatchNorm + ReLU) for validation."""
    T = temporal_size
    out = lax.conv_general_dilated(
        x, weight,
        window_strides=(T, 1, 1),
        padding=((0, 0), (1, 1), (1, 1)),
        dimension_numbers=("NCDHW", "OIDHW", "NCDHW"),
        precision=lax.Precision.HIGHEST)
    inv_std = 1.0 / jnp.sqrt(running_var + eps)
    scale = (gamma * inv_std)[None, :, None, None, None]
    bias = (beta - running_mean * gamma * inv_std)[None, :, None, None, None]
    return jnp.maximum(out * scale + bias, 0.0)


def _run_case(key, *, N, Cin, Cout, D, H, W, T):
    k1, k2, k3, k4, k5, k6 = jax.random.split(key, 6)
    x = jax.random.normal(k1, (N, Cin, D, H, W), jnp.float32)
    weight = 0.1 * jax.random.normal(k2, (Cout, Cin, T, 3, 3), jnp.float32)
    gamma = 1.0 + 0.1 * jax.random.normal(k3, (Cout,), jnp.float32)
    beta = 0.1 * jax.random.normal(k4, (Cout,), jnp.float32)
    running_mean = 0.1 * jax.random.normal(k5, (Cout,), jnp.float32)
    running_var = jnp.abs(1.0 + 0.1 * jax.random.normal(k6, (Cout,), jnp.float32))

    fwd = jax.jit(functools.partial(conv_block_forward, temporal_size=T))
    out = jax.block_until_ready(
        fwd(x, weight, gamma, beta, running_mean, running_var))

    # The kernel feeds the MXU bf16 operands (f32 accumulation), so validate
    # against an f32 reference of the bf16-rounded inputs.
    x_r = x.astype(jnp.bfloat16).astype(jnp.float32)
    w_r = weight.astype(jnp.bfloat16).astype(jnp.float32)
    ref = _reference(x_r, w_r, gamma, beta, running_mean, running_var,
                     temporal_size=T)
    assert out.shape == ref.shape, (out.shape, ref.shape)
    err = float(jnp.max(jnp.abs(out - ref)))
    assert jnp.allclose(out, ref, atol=1e-3, rtol=1e-3), f"max abs err {err}"


if __name__ == "__main__":
    key = jax.random.PRNGKey(0)
    k_a, k_b = jax.random.split(key)
    # T=1: standard per-frame 3x3 conv path
    _run_case(k_a, N=2, Cin=4, Cout=8, D=2, H=16, W=16, T=1)
    # T=2, D=5: exercises the temporal fold and PyTorch-style frame truncation
    _run_case(k_b, N=2, Cin=4, Cout=8, D=5, H=16, W=16, T=2)
    print("KERNEL_OK")
</pallas_src>

<mosaic_0001>
module attributes {stable_mosaic.version = 11 : i64} {
  func.func @_convbnrelu_kernel(%arg0: i32, %arg1: i32, %arg2: memref<1x4x1x16x16xf32, #tpu.memory_space<vmem>>, %arg3: memref<8x36xbf16, #tpu.memory_space<vmem>>, %arg4: memref<8x1xf32, #tpu.memory_space<vmem>>, %arg5: memref<8x1xf32, #tpu.memory_space<vmem>>, %arg6: memref<1x8x384xf32, #tpu.memory_space<vmem>>, %arg7: memref<4x422xbf16, #tpu.memory_space<vmem>>, %arg8: memref<36x384xbf16, #tpu.memory_space<vmem>>) attributes {dimension_semantics = [#tpu.dimension_semantics<parallel>, #tpu.dimension_semantics<parallel>], iteration_bounds = array<i64: 2, 2>, scalar_prefetch = 0 : i64, scratch_operands = 2 : i64, tpu.core_type = #tpu.core_type<tc>, window_params = [{transform_indices = @transform_0, window_bounds = array<i64: 1, 4, 1, 16, 16>}, {pipeline_mode = #tpu.pipeline_mode<synchronous>, transform_indices = @transform_1, window_bounds = array<i64: 8, 36>}, {pipeline_mode = #tpu.pipeline_mode<synchronous>, transform_indices = @transform_2, window_bounds = array<i64: 8, 1>}, {pipeline_mode = #tpu.pipeline_mode<synchronous>, transform_indices = @transform_3, window_bounds = array<i64: 8, 1>}, {transform_indices = @transform_4, window_bounds = array<i64: 1, 8, 384>}]} {
    %cst = arith.constant 0.000000e+00 : bf16
    %0 = vector.broadcast %cst : bf16 to vector<4x422xbf16>
    %c0 = arith.constant 0 : index
    %c0_0 = arith.constant 0 : index
    %1 = vector.load %arg7[%c0, %c0_0] : memref<4x422xbf16, #tpu.memory_space<vmem>>, vector<4x422xbf16>
    tpu.vector_store %arg7[%c0, %c0_0], %0 {strides = array<i32>} : memref<4x422xbf16, #tpu.memory_space<vmem>>, vector<4x422xbf16>,
    %c0_1 = arith.constant 0 : index
    %c0_2 = arith.constant 0 : index
    %c0_3 = arith.constant 0 : index
    %c0_4 = arith.constant 0 : index
    %c0_5 = arith.constant 0 : index
    %2 = vector.load %arg2[%c0_1, %c0_2, %c0_3, %c0_4, %c0_5] : memref<1x4x1x16x16xf32, #tpu.memory_space<vmem>>, vector<1x4x1x16x16xf32>
    %3 = vector.shape_cast %2 : vector<1x4x1x16x16xf32> to vector<4x1x16x16xf32>
    %4 = arith.truncf %3 : vector<4x1x16x16xf32> to vector<4x1x16x16xbf16>
    %5 = vector.shape_cast %4 : vector<4x1x16x16xbf16> to vector<4x16x16xbf16>
    %6 = vector.extract_strided_slice %5 {offsets = [0, 0, 0], sizes = [4, 1, 16], strides = [1, 1, 1]} : vector<4x16x16xbf16> to vector<4x1x16xbf16>
    %7 = vector.shape_cast %6 : vector<4x1x16xbf16> to vector<4x16xbf16>
    %c0_6 = arith.constant 0 : index
    %c19 = arith.constant 19 : index
    %8 = vector.load %arg7[%c0_6, %c19] : memref<4x422xbf16, #tpu.memory_space<vmem>>, vector<4x16xbf16>
    tpu.vector_store %arg7[%c0_6, %c19], %7 {strides = array<i32>} : memref<4x422xbf16, #tpu.memory_space<vmem>>, vector<4x16xbf16>,
    %9 = vector.extract_strided_slice %5 {offsets = [0, 1, 0], sizes = [4, 1, 16], strides = [1, 1, 1]} : vector<4x16x16xbf16> to vector<4x1x16xbf16>
    %10 = vector.shape_cast %9 : vector<4x1x16xbf16> to vector<4x16xbf16>
    %c0_7 = arith.constant 0 : index
    %c37 = arith.constant 37 : index
    %11 = vector.load %arg7[%c0_7, %c37] : memref<4x422xbf16, #tpu.memory_space<vmem>>, vector<4x16xbf16>
    tpu.vector_store %arg7[%c0_7, %c37], %10 {strides = array<i32>} : memref<4x422xbf16, #tpu.memory_space<vmem>>, vector<4x16xbf16>,
    %12 = vector.extract_strided_slice %5 {offsets = [0, 2, 0], sizes = [4, 1, 16], strides = [1, 1, 1]} : vector<4x16x16xbf16> to vector<4x1x16xbf16>
    %13 = vector.shape_cast %12 : vector<4x1x16xbf16> to vector<4x16xbf16>
    %c0_8 = arith.constant 0 : index
    %c55 = arith.constant 55 : index
    %14 = vector.load %arg7[%c0_8, %c55] : memref<4x422xbf16, #tpu.memory_space<vmem>>, vector<4x16xbf16>
    tpu.vector_store %arg7[%c0_8, %c55], %13 {strides = array<i32>} : memref<4x422xbf16, #tpu.memory_space<vmem>>, vector<4x16xbf16>,
    %15 = vector.extract_strided_slice %5 {offsets = [0, 3, 0], sizes = [4, 1, 16], strides = [1, 1, 1]} : vector<4x16x16xbf16> to vector<4x1x16xbf16>
    %16 = vector.shape_cast %15 : vector<4x1x16xbf16> to vector<4x16xbf16>
    %c0_9 = arith.constant 0 : index
    %c73 = arith.constant 73 : index
    %17 = vector.load %arg7[%c0_9, %c73] : memref<4x422xbf16, #tpu.memory_space<vmem>>, vector<4x16xbf16>
    tpu.vector_store %arg7[%c0_9, %c73], %16 {strides = array<i32>} : memref<4x422xbf16, #tpu.memory_space<vmem>>, vector<4x16xbf16>,
    %18 = vector.extract_strided_slice %5 {offsets = [0, 4, 0], sizes = [4, 1, 16], strides = [1, 1, 1]} : vector<4x16x16xbf16> to vector<4x1x16xbf16>
    %19 = vector.shape_cast %18 : vector<4x1x16xbf16> to vector<4x16xbf16>
    %c0_10 = arith.constant 0 : index
    %c91 = arith.constant 91 : index
    %20 = vector.load %arg7[%c0_10, %c91] : memref<4x422xbf16, #tpu.memory_space<vmem>>, vector<4x16xbf16>
    tpu.vector_store %arg7[%c0_10, %c91], %19 {strides = array<i32>} : memref<4x422xbf16, #tpu.memory_space<vmem>>, vector<4x16xbf16>,
    %21 = vector.extract_strided_slice %5 {offsets = [0, 5, 0], sizes = [4, 1, 16], strides = [1, 1, 1]} : vector<4x16x16xbf16> to vector<4x1x16xbf16>
    %22 = vector.shape_cast %21 : vector<4x1x16xbf16> to vector<4x16xbf16>
    %c0_11 = arith.constant 0 : index
    %c109 = arith.constant 109 : index
    %23 = vector.load %arg7[%c0_11, %c109] : memref<4x422xbf16, #tpu.memory_space<vmem>>, vector<4x16xbf16>
    tpu.vector_store %arg7[%c0_11, %c109], %22 {strides = array<i32>} : memref<4x422xbf16, #tpu.memory_space<vmem>>, vector<4x16xbf16>,
    %24 = vector.extract_strided_slice %5 {offsets = [0, 6, 0], sizes = [4, 1, 16], strides = [1, 1, 1]} : vector<4x16x16xbf16> to vector<4x1x16xbf16>
    %25 = vector.shape_cast %24 : vector<4x1x16xbf16> to vector<4x16xbf16>
    %c0_12 = arith.constant 0 : index
    %c127 = arith.constant 127 : index
    %26 = vector.load %arg7[%c0_12, %c127] : memref<4x422xbf16, #tpu.memory_space<vmem>>, vector<4x16xbf16>
    tpu.vector_store %arg7[%c0_12, %c127], %25 {strides = array<i32>} : memref<4x422xbf16, #tpu.memory_space<vmem>>, vector<4x16xbf16>,
    %27 = vector.extract_strided_slice %5 {offsets = [0, 7, 0], sizes = [4, 1, 16], strides = [1, 1, 1]} : vector<4x16x16xbf16> to vector<4x1x16xbf16>
    %28 = vector.shape_cast %27 : vector<4x1x16xbf16> to vector<4x16xbf16>
    %c0_13 = arith.constant 0 : index
    %c145 = arith.constant 145 : index
    %29 = vector.load %arg7[%c0_13, %c145] : memref<4x422xbf16, #tpu.memory_space<vmem>>, vector<4x16xbf16>
    tpu.vector_store %arg7[%c0_13, %c145], %28 {strides = array<i32>} : memref<4x422xbf16, #tpu.memory_space<vmem>>, vector<4x16xbf16>,
    %30 = vector.extract_strided_slice %5 {offsets = [0, 8, 0], sizes = [4, 1, 16], strides = [1, 1, 1]} : vector<4x16x16xbf16> to vector<4x1x16xbf16>
    %31 = vector.shape_cast %30 : vector<4x1x16xbf16> to vector<4x16xbf16>
    %c0_14 = arith.constant 0 : index
    %c163 = arith.constant 163 : index
    %32 = vector.load %arg7[%c0_14, %c163] : memref<4x422xbf16, #tpu.memory_space<vmem>>, vector<4x16xbf16>
    tpu.vector_store %arg7[%c0_14, %c163], %31 {strides = array<i32>} : memref<4x422xbf16, #tpu.memory_space<vmem>>, vector<4x16xbf16>,
    %33 = vector.extract_strided_slice %5 {offsets = [0, 9, 0], sizes = [4, 1, 16], strides = [1, 1, 1]} : vector<4x16x16xbf16> to vector<4x1x16xbf16>
    %34 = vector.shape_cast %33 : vector<4x1x16xbf16> to vector<4x16xbf16>
    %c0_15 = arith.constant 0 : index
    %c181 = arith.constant 181 : index
    %35 = vector.load %arg7[%c0_15, %c181] : memref<4x422xbf16, #tpu.memory_space<vmem>>, vector<4x16xbf16>
    tpu.vector_store %arg7[%c0_15, %c181], %34 {strides = array<i32>} : memref<4x422xbf16, #tpu.memory_space<vmem>>, vector<4x16xbf16>,
    %36 = vector.extract_strided_slice %5 {offsets = [0, 10, 0], sizes = [4, 1, 16], strides = [1, 1, 1]} : vector<4x16x16xbf16> to vector<4x1x16xbf16>
    %37 = vector.shape_cast %36 : vector<4x1x16xbf16> to vector<4x16xbf16>
    %c0_16 = arith.constant 0 : index
    %c199 = arith.constant 199 : index
    %38 = vector.load %arg7[%c0_16, %c199] : memref<4x422xbf16, #tpu.memory_space<vmem>>, vector<4x16xbf16>
    tpu.vector_store %arg7[%c0_16, %c199], %37 {strides = array<i32>} : memref<4x422xbf16, #tpu.memory_space<vmem>>, vector<4x16xbf16>,
    %39 = vector.extract_strided_slice %5 {offsets = [0, 11, 0], sizes = [4, 1, 16], strides = [1, 1, 1]} : vector<4x16x16xbf16> to vector<4x1x16xbf16>
    %40 = vector.shape_cast %39 : vector<4x1x16xbf16> to vector<4x16xbf16>
    %c0_17 = arith.constant 0 : index
    %c217 = arith.constant 217 : index
    %41 = vector.load %arg7[%c0_17, %c217] : memref<4x422xbf16, #tpu.memory_space<vmem>>, vector<4x16xbf16>
    tpu.vector_store %arg7[%c0_17, %c217], %40 {strides = array<i32>} : memref<4x422xbf16, #tpu.memory_space<vmem>>, vector<4x16xbf16>,
    %42 = vector.extract_strided_slice %5 {offsets = [0, 12, 0], sizes = [4, 1, 16], strides = [1, 1, 1]} : vector<4x16x16xbf16> to vector<4x1x16xbf16>
    %43 = vector.shape_cast %42 : vector<4x1x16xbf16> to vector<4x16xbf16>
    %c0_18 = arith.constant 0 : index
    %c235 = arith.constant 235 : index
    %44 = vector.load %arg7[%c0_18, %c235] : memref<4x422xbf16, #tpu.memory_space<vmem>>, vector<4x16xbf16>
    tpu.vector_store %arg7[%c0_18, %c235], %43 {strides = array<i32>} : memref<4x422xbf16, #tpu.memory_space<vmem>>, vector<4x16xbf16>,
    %45 = vector.extract_strided_slice %5 {offsets = [0, 13, 0], sizes = [4, 1, 16], strides = [1, 1, 1]} : vector<4x16x16xbf16> to vector<4x1x16xbf16>
    %46 = vector.shape_cast %45 : vector<4x1x16xbf16> to vector<4x16xbf16>
    %c0_19 = arith.constant 0 : index
    %c253 = arith.constant 253 : index
    %47 = vector.load %arg7[%c0_19, %c253] : memref<4x422xbf16, #tpu.memory_space<vmem>>, vector<4x16xbf16>
    tpu.vector_store %arg7[%c0_19, %c253], %46 {strides = array<i32>} : memref<4x422xbf16, #tpu.memory_space<vmem>>, vector<4x16xbf16>,
    %48 = vector.extract_strided_slice %5 {offsets = [0, 14, 0], sizes = [4, 1, 16], strides = [1, 1, 1]} : vector<4x16x16xbf16> to vector<4x1x16xbf16>
    %49 = vector.shape_cast %48 : vector<4x1x16xbf16> to vector<4x16xbf16>
    %c0_20 = arith.constant 0 : index
    %c271 = arith.constant 271 : index
    %50 = vector.load %arg7[%c0_20, %c271] : memref<4x422xbf16, #tpu.memory_space<vmem>>, vector<4x16xbf16>
    tpu.vector_store %arg7[%c0_20, %c271], %49 {strides = array<i32>} : memref<4x422xbf16, #tpu.memory_space<vmem>>, vector<4x16xbf16>,
    %51 = vector.extract_strided_slice %5 {offsets = [0, 15, 0], sizes = [4, 1, 16], strides = [1, 1, 1]} : vector<4x16x16xbf16> to vector<4x1x16xbf16>
    %52 = vector.shape_cast %51 : vector<4x1x16xbf16> to vector<4x16xbf16>
    %c0_21 = arith.constant 0 : index
    %c289 = arith.constant 289 : index
    %53 = vector.load %arg7[%c0_21, %c289] : memref<4x422xbf16, #tpu.memory_space<vmem>>, vector<4x16xbf16>
    tpu.vector_store %arg7[%c0_21, %c289], %52 {strides = array<i32>} : memref<4x422xbf16, #tpu.memory_space<vmem>>, vector<4x16xbf16>,
    %c0_22 = arith.constant 0 : index
    %c0_23 = arith.constant 0 : index
    %54 = vector.load %arg7[%c0_22, %c0_23] : memref<4x422xbf16, #tpu.memory_space<vmem>>, vector<4x384xbf16>
    %c0_24 = arith.constant 0 : index
    %c0_25 = arith.constant 0 : index
    %55 = vector.load %arg8[%c0_24, %c0_25] : memref<36x384xbf16, #tpu.memory_space<vmem>>, vector<4x384xbf16>
    tpu.vector_store %arg8[%c0_24, %c0_25], %54 {strides = array<i32>} : memref<36x384xbf16, #tpu.memory_space<vmem>>, vector<4x384xbf16>,
    %c0_26 = arith.constant 0 : index
    %c1 = arith.constant 1 : index
    %56 = vector.load %arg7[%c0_26, %c1] : memref<4x422xbf16, #tpu.memory_space<vmem>>, vector<4x384xbf16>
    %c4 = arith.constant 4 : index
    %c0_27 = arith.constant 0 : index
    %57 = vector.load %arg8[%c4, %c0_27] : memref<36x384xbf16, #tpu.memory_space<vmem>>, vector<4x384xbf16>
    tpu.vector_store %arg8[%c4, %c0_27], %56 {strides = array<i32>} : memref<36x384xbf16, #tpu.memory_space<vmem>>, vector<4x384xbf16>,
    %c0_28 = arith.constant 0 : index
    %c2 = arith.constant 2 : index
    %58 = vector.load %arg7[%c0_28, %c2] : memref<4x422xbf16, #tpu.memory_space<vmem>>, vector<4x384xbf16>
    %c8 = arith.constant 8 : index
    %c0_29 = arith.constant 0 : index
    %59 = vector.load %arg8[%c8, %c0_29] : memref<36x384xbf16, #tpu.memory_space<vmem>>, vector<4x384xbf16>
    tpu.vector_store %arg8[%c8, %c0_29], %58 {strides = array<i32>} : memref<36x384xbf16, #tpu.memory_space<vmem>>, vector<4x384xbf16>,
    %c0_30 = arith.constant 0 : index
    %c18 = arith.constant 18 : index
    %60 = vector.load %arg7[%c0_30, %c18] : memref<4x422xbf16, #tpu.memory_space<vmem>>, vector<4x384xbf16>
    %c12 = arith.constant 12 : index
    %c0_31 = arith.constant 0 : index
    %61 = vector.load %arg8[%c12, %c0_31] : memref<36x384xbf16, #tpu.memory_space<vmem>>, vector<4x384xbf16>
    tpu.vector_store %arg8[%c12, %c0_31], %60 {strides = array<i32>} : memref<36x384xbf16, #tpu.memory_space<vmem>>, vector<4x384xbf16>,
    %c0_32 = arith.constant 0 : index
    %c19_33 = arith.constant 19 : index
    %62 = vector.load %arg7[%c0_32, %c19_33] : memref<4x422xbf16, #tpu.memory_space<vmem>>, vector<4x384xbf16>
    %c16 = arith.constant 16 : index
    %c0_34 = arith.constant 0 : index
    %63 = vector.load %arg8[%c16, %c0_34] : memref<36x384xbf16, #tpu.memory_space<vmem>>, vector<4x384xbf16>
    tpu.vector_store %arg8[%c16, %c0_34], %62 {strides = array<i32>} : memref<36x384xbf16, #tpu.memory_space<vmem>>, vector<4x384xbf16>,
    %c0_35 = arith.constant 0 : index
    %c20 = arith.constant 20 : index
    %64 = vector.load %arg7[%c0_35, %c20] : memref<4x422xbf16, #tpu.memory_space<vmem>>, vector<4x384xbf16>
    %c20_36 = arith.constant 20 : index
    %c0_37 = arith.constant 0 : index
    %65 = vector.load %arg8[%c20_36, %c0_37] : memref<36x384xbf16, #tpu.memory_space<vmem>>, vector<4x384xbf16>
    tpu.vector_store %arg8[%c20_36, %c0_37], %64 {strides = array<i32>} : memref<36x384xbf16, #tpu.memory_space<vmem>>, vector<4x384xbf16>,
    %c0_38 = arith.constant 0 : index
    %c36 = arith.constant 36 : index
    %66 = vector.load %arg7[%c0_38, %c36] : memref<4x422xbf16, #tpu.memory_space<vmem>>, vector<4x384xbf16>
    %c24 = arith.constant 24 : index
    %c0_39 = arith.constant 0 : index
    %67 = vector.load %arg8[%c24, %c0_39] : memref<36x384xbf16, #tpu.memory_space<vmem>>, vector<4x384xbf16>
    tpu.vector_store %arg8[%c24, %c0_39], %66 {strides = array<i32>} : memref<36x384xbf16, #tpu.memory_space<vmem>>, vector<4x384xbf16>,
    %c0_40 = arith.constant 0 : index
    %c37_41 = arith.constant 37 : index
    %68 = vector.load %arg7[%c0_40, %c37_41] : memref<4x422xbf16, #tpu.memory_space<vmem>>, vector<4x384xbf16>
    %c28 = arith.constant 28 : index
    %c0_42 = arith.constant 0 : index
    %69 = vector.load %arg8[%c28, %c0_42] : memref<36x384xbf16, #tpu.memory_space<vmem>>, vector<4x384xbf16>
    tpu.vector_store %arg8[%c28, %c0_42], %68 {strides = array<i32>} : memref<36x384xbf16, #tpu.memory_space<vmem>>, vector<4x384xbf16>,
    %c0_43 = arith.constant 0 : index
    %c38 = arith.constant 38 : index
    %70 = vector.load %arg7[%c0_43, %c38] : memref<4x422xbf16, #tpu.memory_space<vmem>>, vector<4x384xbf16>
    %c32 = arith.constant 32 : index
    %c0_44 = arith.constant 0 : index
    %71 = vector.load %arg8[%c32, %c0_44] : memref<36x384xbf16, #tpu.memory_space<vmem>>, vector<4x384xbf16>
    tpu.vector_store %arg8[%c32, %c0_44], %70 {strides = array<i32>} : memref<36x384xbf16, #tpu.memory_space<vmem>>, vector<4x384xbf16>,
    %c0_45 = arith.constant 0 : index
    %c0_46 = arith.constant 0 : index
    %72 = vector.load %arg3[%c0_45, %c0_46] : memref<8x36xbf16, #tpu.memory_space<vmem>>, vector<8x36xbf16>
    %c0_47 = arith.constant 0 : index
    %c0_48 = arith.constant 0 : index
    %73 = vector.load %arg8[%c0_47, %c0_48] : memref<36x384xbf16, #tpu.memory_space<vmem>>, vector<36x384xbf16>
    %cst_49 = arith.constant dense<0.000000e+00> : vector<8x384xf32>
    %74 = tpu.matmul %72, %73, %cst_49 {dimension_numbers = #tpu.dot_dimension_numbers<[1], [0], [0], [1], [0, 0, 1, 1], [], []>} : vector<8x36xbf16>, vector<36x384xbf16>, vector<8x384xf32> -> vector<8x384xf32>
    %c0_50 = arith.constant 0 : index
    %c0_51 = arith.constant 0 : index
    %75 = vector.load %arg4[%c0_50, %c0_51] : memref<8x1xf32, #tpu.memory_space<vmem>>, vector<8x1xf32>
    %76 = vector.broadcast %75 : vector<8x1xf32> to vector<8x384xf32>
    %77 = arith.mulf %74, %76 : vector<8x384xf32>
    %c0_52 = arith.constant 0 : index
    %c0_53 = arith.constant 0 : index
    %78 = vector.load %arg5[%c0_52, %c0_53] : memref<8x1xf32, #tpu.memory_space<vmem>>, vector<8x1xf32>
    %79 = vector.broadcast %78 : vector<8x1xf32> to vector<8x384xf32>
    %80 = arith.addf %77, %79 : vector<8x384xf32>
    %cst_54 = arith.constant 0.000000e+00 : f32
    %81 = vector.broadcast %cst_54 : f32 to vector<8x384xf32>
    %82 = arith.maximumf %80, %81 : vector<8x384xf32>
    %c0_55 = arith.constant 0 : index
    %c0_56 = arith.constant 0 : index
    %c0_57 = arith.constant 0 : index
    %83 = vector.load %arg6[%c0_55, %c0_56, %c0_57] : memref<1x8x384xf32, #tpu.memory_space<vmem>>, vector<1x8x384xf32>
    %84 = vector.shape_cast %83 : vector<1x8x384xf32> to vector<8x384xf32>
    %85 = vector.shape_cast %82 : vector<8x384xf32> to vector<1x8x384xf32>
    tpu.vector_store %arg6[%c0_55, %c0_56, %c0_57], %85 {strides = array<i32>} : memref<1x8x384xf32, #tpu.memory_space<vmem>>, vector<1x8x384xf32>,
    return
  }
  func.func @transform_0(%arg0: i32, %arg1: i32) -> (i32, i32, i32, i32, i32) {
    %c0_i32 = arith.constant 0 : i32
    %c0_i32_0 = arith.constant 0 : i32
    %c0_i32_1 = arith.constant 0 : i32
    %c0_i32_2 = arith.constant 0 : i32
    return %arg0, %c0_i32, %arg1, %c0_i32_0, %c0_i32_1 : i32, i32, i32, i32, i32
  }
  func.func @transform_1(%arg0: i32, %arg1: i32) -> (i32, i32) {
    %c0_i32 = arith.constant 0 : i32
    %c0_i32_0 = arith.constant 0 : i32
    %c0_i32_1 = arith.constant 0 : i32
    return %c0_i32, %c0_i32_0 : i32, i32
  }
  func.func @transform_2(%arg0: i32, %arg1: i32) -> (i32, i32) {
    %c0_i32 = arith.constant 0 : i32
    %c0_i32_0 = arith.constant 0 : i32
    %c0_i32_1 = arith.constant 0 : i32
    return %c0_i32, %c0_i32_0 : i32, i32
  }
  func.func @transform_3(%arg0: i32, %arg1: i32) -> (i32, i32) {
    %c0_i32 = arith.constant 0 : i32
    %c0_i32_0 = arith.constant 0 : i32
    %c0_i32_1 = arith.constant 0 : i32
    return %c0_i32, %c0_i32_0 : i32, i32
  }
  func.func @transform_4(%arg0: i32, %arg1: i32) -> (i32, i32, i32) {
    %c0_i32 = arith.constant 0 : i32
    %c0_i32_0 = arith.constant 0 : i32
    return %arg0, %c0_i32, %arg1 : i32, i32, i32
  }
}

</mosaic_0001>

<bundles_post_ra>
// kernel: conv_block_forward.1
= control target key start
LH: loop header
LB: loop body
LE: loop exit
PB: predicated region body
PF: predicated region fallthrough
CT: control target
= control target key end

     0   :  { %9 = vsyncpa [#allocation5], 0  ;;  %s1958_s0 = inlined_call_operand.hbm [shape: f32[2,4,2,16,16], index: 0, kind: input, shape index: {}]   ;;  %s1959_s1 = inlined_call_operand.vmem [shape: bf16[8,36], index: 1, kind: input, shape index: {}]   ;;  %s1960_s2 = inlined_call_operand.vmem [shape: f32[8,1], index: 2, kind: input, shape index: {}]   ;;  %s1961_s3 = inlined_call_operand.vmem [shape: f32[8,1], index: 3, kind: input, shape index: {}]   ;;  %s1962_s4 = inlined_call_operand.vmem [shape: f32[2,8,768], index: 4, kind: output, shape index: {}]  }
   0x1   :  { %11 = vsyncpa [#allocation5 + $0x1], 0  ;;  %s1635_s15 = smov 0   ;;  %s1637_s16 = smov 0  }
   0x2   :  { %s1639_s17 = smov 0   ;;  %s1641_s18 = smov 0  }
   0x3   :  { %s1643_s19 = smov 0   ;;  %s1645_s20 = smov 0  }
   0x4   :  { %s1647_s21 = smov 0   ;;  %s1649_s22 = smov 0  }
   0x5 LB: > { %s26_s23 = sadd.s32 1, %s1569_s20  ;;  %s29_s24 = sadd.s32 1, %s1573_s21  ;;  %s1577_s22 = sphi %s1649_s22, %s17_s22   ;;  %s1573_s21 = sphi %s1647_s21, %s1971_s21   ;;  %s1569_s20 = sphi %s1645_s20, %s1970_s20   ;;  %s1565_s19 = sphi %s1643_s19, %s1969_s19   ;;  %s1561_s18 = sphi %s1641_s18, %s1968_s18   ;;  %s1557_s17 = sphi %s1639_s17, %s1967_s17   ;;  %s1553_s16 = sphi %s1637_s16, %s1966_s16   ;;  %s1549_s15 = sphi %s1635_s15, %s1965_s15  }
   0x6   : > { %p27_p0 = scmp.ge.s32.totalorder %s26_s23, 2  ;;  %s1344_s25 = sadd.s32 4294967295, %s1577_s22  }
   0x7   : > { %p45_p1 = scmp.ne.s32.totalorder %s1557_s17, %s1553_s16  ;;  %p46_p2 = scmp.eq.s32.totalorder %s1577_s22, 0 }
   0x8   : > { %s1973_s23 = smov (%p27_p0, %s26_s23), 0  ;;  %s1975_s24 = smov (!%p27_p0, %s29_s24), %s1573_s21 }
   0x9   : > { %s34_s26 = ssub.s32 %s1569_s20, %s1973_s23  ;;  %p31_p3 = scmp.ge.s32.totalorder %s1975_s24, 2 }
   0xa   : > { %p51_p4 = scmp.ne.s32.totalorder %s1553_s16, %s1549_s15  ;;  %p1685_p5 = por %p46_p2, %p45_p1 }
   0xb   : > { %p52_p6 = scmp.eq.s32.totalorder %s1344_s25, 0  ;;  %s1977_s24 = smov (%p31_p3, %s1975_s24), 0 }
   0xc   : > { %s33_s29 = ssub.s32 %s1573_s21, %s1977_s24  ;;  %s38_s5 = sadd.s32 1, %s1557_s17 }
   0xd   : > { %p1691_p7 = por %p52_p6, %p51_p4  ;;  %s35_s30 = sor.u32 %s34_s26, %s33_s29 }
   0xe   : > { %p36_p8 = scmp.eq.s32.totalorder %s35_s30, 0  ;;  %p1347_p9 = scmp.ge.s32.totalorder %s1577_s22, 4 }
  0x10   : > { %s1699_s6 = scalar_select %p36_p8, %s1557_s17, %s38_s5  }
  0x11   : > { %171 = sbr.rel (%p1347_p9) target bundleno = 40 (0x28), region = 28 }
  0x18   : > { %s175_s7 = sand.u32 1, %s1557_s17   ;;  %s1349_s8 = sshll.u32 %s1569_s20, 1 }
  0x19   : > { %s1348_s9 = sshll.u32 %s175_s7, 6  ;;  %s1350_s10 = sshll.u32 %s1573_s21, 4 }
  0x1a   : > { %s185_s11 = sadd.s32 %s1350_s10, %s1349_s8  ;;  %s179_s12 = scalar_lea.vmem [#allocation4], %s1348_s9 }
  0x1b   : > { %s200_s13 = sshll.u32 %s179_s12, 4  ;;  %s1351_s14 = sshll.u32 %s185_s11, 7  ;;  %s201_s13 = int_to_ptr.vmem [resolvable:$true] %s200_s13 }
  0x1c   : > { %s1392_s15 = scalar_select %p1685_p5, [#allocation0], [#allocation8] }
  0x1d   : > { %s1579_s25 = smov 512   ;;  %s1580_s29 = smov 256  }
  0x1e   : > { %1393 = sst [smem:[#allocation7]] (%p1685_p5), %s1579_s25  ;;  %s1581_s30 = smov 2  }
  0x1f   : > { %s192_s26 = sld [smem:[%s1392_s15]]   ;;  %s1582_s5 = smov 128  }
  0x20   : > { %1394 = sst [smem:[#allocation7 + $0x1]] (%p1685_p5), %s1580_s29  ;;  %s187_s10 = scalar_lea.hbm %s1958_s0, %s1351_s14 }
  0x21   : > { %1395 = sst [smem:[#allocation7 + $0x2]] (%p1685_p5), %s1581_s30  ;;  %s1583_s11 = smov 8  }
  0x22   : > { %1396 = sst [smem:[#allocation7 + $0x3]] (%p1685_p5), %s1582_s5  ;;  %s176_s25 = scalar_lea.sflag [#allocation5], %s175_s7 }
  0x23   : > { %1397 = sst [smem:[#allocation7 + $0x4]] (%p1685_p5), %s1582_s5  ;;  %s1584_s29 = smov [#allocation6]  }
  0x24   : > { %1398 = sst [smem:[#allocation7 + $0x5]] (%p1685_p5), %s1583_s11 }
  0x25   : > { %s1352_s12 = sshll.u32 %s192_s26, 26 }
  0x26   : > { %s1353_s15 = sadd.s32 134217728, %s1352_s12 }
  0x27   : > { %1399 = dma.general (%p1685_p5), %s187_s10, 1024, %s201_s13, %s176_s25, %s1584_s29, [#allocation7], %s1353_s15, 0  }
  0x28 PF: > { %p1354_p10 = scmp.ge.s32.totalorder %s1577_s22, 1  ;;  %p221_p11 = scmp.lt.s32.totalorder %s1577_s22, 5 }
  0x2a   : > { %p222_p12 = pnand %p1354_p10, %p221_p11 }
  0x2b   : > { %s227_s14 = sand.u32 (!%p222_p12), 1, %s1553_s16  }
  0x2c   : > { %225 = sbr.rel (%p222_p12) target bundleno = 616 (0x268), region = 36  ;;  %s1355_s30 = sshll.u32 (!%p222_p12), %s227_s14, 6 }
  0x2d   : > { %s228_s5 = scalar_lea.sflag (!%p222_p12), [#allocation5], %s227_s14  ;;  %s231_s8 = scalar_lea.vmem (!%p222_p12), [#allocation4], %s1355_s30 }
  0x33   : > { %1544 = dma.done.wait (%p1691_p7), %s228_s5, 1024  }
  0x34   : > { %1546 = vsyncadd (%p1691_p7), %s228_s5, 4294966272  ;;  %v298_v0 = vlaneseq  ;;  %v1585_v1 = vmov 1983009808   ;;  %v279_v6 = vld [vmem:[%s231_s8] sm:$0xff]  ;;  %v280_v7 = vld [vmem:[%s231_s8 + $0x8] sm:$0xff]  ;;  %vm356_vm0 = vcmask 1041409  }
  0x35   : > { %v296_v2 = vunpack.c.l.s4 %v1585_v1  ;;  %v281_v8 = vld [vmem:[%s231_s8 + $0x10] sm:$0xff]  ;;  %v282_v9 = vld [vmem:[%s231_s8 + $0x18] sm:$0xff]  ;;  %v283_v10 = vld [vmem:[%s231_s8 + $0x20] sm:$0xff]  ;;  %v287_v12 = vpack.c.bf16 %v280_v7, %v279_v6  ;;  %v1357_v13 = vpack.c.bf16 %v280_v7, %v280_v7  ;;  %vm359_vm1 = vcmask 1042434   ;;  %s1586_s27 = smov 55   ;;  %s1587_s28 = smov 19  }
  0x36   : > { %v299_v3 = vshrl.u32 %v298_v0, 7  ;;  %v284_v11 = vld [vmem:[%s231_s8 + $0x28] sm:$0xff]  ;;  %v285_v14 = vld [vmem:[%s231_s8 + $0x30] sm:$0xff]  ;;  %v286_v15 = vld [vmem:[%s231_s8 + $0x38] sm:$0xff]  ;;  %v288_v16 = vpack.c.bf16 %v282_v9, %v281_v8  ;;  %v1358_v19 = vpack.c.bf16 %v282_v9, %v282_v9  ;;  %vm362_vm2 = vcmask 1043459   ;;  %s1588_s7 = smov 73  }
  0x37   : > { %v297_v4 = vunpack.c.0.s8 %v296_v2  ;;  %v289_v17 = vpack.c.bf16 %v284_v11, %v283_v10  ;;  %v1359_v18 = vpack.c.bf16 %v284_v11, %v284_v11  ;;  %v290_v20 = vpack.c.bf16 %v286_v15, %v285_v14  ;;  %s1589_s13 = smov 37   ;;  %s1590_s26 = smov 53  }
  0x38   : > { %v1360_v22 = vpack.c.bf16 %v286_v15, %v286_v15  ;;  %s1591_s9 = smov 35   ;;  %s1592_s10 = smov 91   ;;  %vm271_vm3 = vcmask 1041408   ;;  %vm272_vm4 = vcmask 1043458   ;;  %vm274_vm6 = vcmask 1045508  }
  0x39   : > { %v1731_v5 = vsub.s32 %v297_v4, %v299_v3  ;;  %s1593_s11 = smov 127   ;;  %s1594_s12 = smov 17   ;;  %vm273_vm5 = vmor %vm272_vm4, %vm271_vm3  ;;  %vm276_vm8 = vcmask 310278   ;;  %vm375_vm10 = vcmask 279704   ;;  %vm394_vm11 = vcmask 427304  }
  0x3a   : > { %s1595_s15 = smov 109   ;;  %s1596_s25 = smov 71   ;;  %vm275_vm7 = vmor %vm274_vm6, %vm273_vm5  ;;  %vm413_vm12 = vcmask 574904   ;;  %vm432_vm13 = vcmask 722504   ;;  %vm487_vm14 = vcmask 870104   ;;  %vm528_vm15 = vcmask 1042424  }
  0x3b   : > { %v1734_v21 = vrot.slane %v287_v12, %v1731_v5  ;;  %v1737_v23 = vrot.slane %v1357_v13, %v1731_v5  ;;  %v1740_v24 = vrot.slane %v288_v16, %v1731_v5  ;;  %v315_v25 = vrot.slane %v289_v17, %v1731_v5  ;;  %s1597_s29 = smov 125   ;;  %s1598_s14 = smov 89   ;;  %vm277_vm9 = vmor %vm276_vm8, %vm275_vm7 }
  0x3c   : > { %v1744_v26 = vrot.slane %v1359_v18, %v1731_v5  ;;  %v1747_v27 = vrot.slane %v1358_v19, %v1731_v5  ;;  %v1750_v28 = vrot.slane %v290_v20, %v1731_v5  ;;  %v1755_v30 = vrot.slane %v1360_v22, %v1731_v5  ;;  %s1600_s30 = smov 107   ;;  %s1601_s5 = smov 15  }
  0x3d   : > { %v329_v29 = vrot.slane %v1734_v21, %v1731_v5  ;;  %v589_v31 = vrot.slane %v1737_v23, %v1731_v5  ;;  %v336_v32 = vrot.slane %v1740_v24, %v1731_v5  ;;  %v343_v33 = vrot.slane %v315_v25, %v1731_v5  ;;  %s1602_s8 = smov 33   ;;  %p261_p13 = scmp.lt.s32.totalorder %s1565_s19, 1 }
  0x3e   : > { %v435_v34 = vcombine.high %v1740_v24, %v1740_v24  ;;  %v436_v35 = vcombine.high %v315_v25, %v315_v25  ;;  %v350_v36 = vrot.slane %v1750_v28, %v1731_v5  ;;  %v437_v38 = vcombine.high %v1750_v28, %v1750_v28 }
  0x3f   : > { %v351_v37 = vunpack.c.l.b16 %v329_v29  ;;  %v596_v39 = vrot.slane %v1747_v27, %v1731_v5  ;;  %v352_v40 = vunpack.c.l.b16 %v336_v32  ;;  %v353_v41 = vunpack.c.l.b16 %v343_v33  ;;  %s1979_s19 = smov (!%p261_p13, %s1565_s19), 1 }
  0x40   : > { %v458_v42 = vrot.slane %v436_v35, %v1731_v5  ;;  %v603_v43 = vrot.slane %v1744_v26, %v1731_v5  ;;  %v354_v44 = vunpack.c.l.b16 %v350_v36  ;;  %v610_v10 = vrot.slane %v1755_v30, %v1731_v5 }
  0x41   : > { %v396_v45 = vrot.slane %v351_v37, 2  ;;  %v415_v46 = vrot.slane %v351_v37, 3  ;;  %v377_v47 = vrot.slane %v351_v37, 1  ;;  %v397_v48 = vrot.slane %v352_v40, 1 }
  0x42   : > { %v355_v49 = vrot.slane %v352_v40, 7  ;;  %v358_v50 = vrot.slane %v353_v41, 6  ;;  %v416_v51 = vrot.slane %v352_v40, 2  ;;  %v400_v52 = vrot.slane %v354_v44, 7 }
  0x43   : > { %v361_v53 = vrot.slane %v354_v44, 5  ;;  %v418_v54 = vrot.slane %v353_v41, 1  ;;  %v378_v55 = vsel %vm356_vm0, %v352_v40, %v377_v47  ;;  %v398_v56 = vsel %vm356_vm0, %v397_v48, %v396_v45 }
  0x44   : > { %v357_v57 = vsel %vm356_vm0, %v355_v49, %v351_v37  ;;  %v417_v58 = vsel %vm356_vm0, %v416_v51, %v415_v46  ;;  %v379_v59 = vrot.slane %v353_v41, 7  ;;  %v399_v60 = vsel %vm359_vm1, %v353_v41, %v398_v56 }
  0x45   : > { %v360_v61 = vsel %vm359_vm1, %v358_v50, %v357_v57  ;;  %v419_v62 = vsel %vm359_vm1, %v418_v54, %v417_v58  ;;  %v381_v63 = vrot.slane %v354_v44, 6  ;;  %v401_v0 = vsel %vm362_vm2, %v400_v52, %v399_v60 }
  0x46   : > { %v363_v1 = vsel %vm362_vm2, %v361_v53, %v360_v61  ;;  %v420_v2 = vsel %vm362_vm2, %v354_v44, %v419_v62  ;;  %v380_v3 = vsel %vm359_vm1, %v379_v59, %v378_v55  ;;  %v402_v4 = vpack.c.b16 %v401_v0, %v401_v0 }
  0x47   : > { %v364_v6 = vpack.c.b16 %v363_v1, %v363_v1  ;;  %v421_v7 = vpack.c.b16 %v420_v2, %v420_v2  ;;  %v382_v8 = vsel %vm362_vm2, %v381_v63, %v380_v3  ;;  %v1787_v11 = vunpack.c.l.b16 %v589_v31 }
  0x48   : > { %v383_v9 = vpack.c.b16 %v382_v8, %v382_v8  ;;  %v1789_v12 = vunpack.c.l.b16 %v596_v39  ;;  %v409_v13 = vrot.slane %v402_v4, %v1731_v5  ;;  %v1794_v16 = vunpack.c.l.b16 %v603_v43 }
  0x49   : > { %v371_v14 = vrot.slane %v364_v6, %v1731_v5  ;;  %v428_v15 = vrot.slane %v421_v7, %v1731_v5  ;;  %v1797_v18 = vunpack.c.l.b16 %v610_v10  ;;  %v634_v19 = vrot.slane %v1787_v11, 1 }
  0x4a   : > { %v390_v17 = vrot.slane %v383_v9, %v1731_v5  ;;  %v615_v20 = vrot.slane %v1789_v12, 7  ;;  %410 = vrot.lane.b32.xlu1 %v409_v13, %s1586_s27  ;;  %v636_v22 = vrot.slane %v1794_v16, 7  ;;  %v617_v24 = vrot.slane %v1794_v16, 6  ;;  %s1603_s27 = smov 126  }
  0x4b   : > { %372 = vrot.lane.b32.xlu0 %v371_v14, %s1587_s28  ;;  %v434_v25 = vcombine.high %v1734_v21, %v1734_v21  ;;  %v451_v28 = vrot.slane %v435_v34, %v1731_v5  ;;  %v635_v29 = vsel %vm356_vm0, %v1789_v12, %v634_v19  ;;  %v638_v31 = vrot.slane %v1797_v18, 6  ;;  %s1604_s28 = smov 110  }
  0x4c   : > { %v616_v32 = vsel %vm356_vm0, %v615_v20, %v1787_v11  ;;  %v619_v33 = vrot.slane %v1797_v18, 5  ;;  %v637_v35 = vsel %vm359_vm1, %v636_v22, %v635_v29  ;;  %v465_v21 = vrot.slane %v437_v38, %v1731_v5 }
  0x4d   : > { %v618_v36 = vsel %vm359_vm1, %v617_v24, %v616_v32  ;;  %v444_v37 = vrot.slane %v434_v25, %v1731_v5  ;;  %v639_v34 = vsel %vm362_vm2, %v638_v31, %v637_v35  ;;  %v467_v40 = vunpack.c.l.b16 %v451_v28 }
  0x4e   : > { %v620_v39 = vsel %vm362_vm2, %v619_v33, %v618_v36  ;;  %v468_v41 = vunpack.c.l.b16 %v458_v42  ;;  %429 = vrot.lane.b32.xlu1 %v428_v15, %s1588_s7  ;;  %v640_v43 = vpack.c.b16 %v639_v34, %v639_v34  ;;  %v469_v46 = vunpack.c.l.b16 %v465_v21  ;;  %s1605_s7 = smov 92  }
  0x4f   : > { %391 = vrot.lane.b32.xlu0 %v390_v17, %s1589_s13  ;;  %v621_v44 = vpack.c.b16 %v620_v39, %v620_v39  ;;  %v466_v45 = vunpack.c.l.b16 %v444_v37  ;;  %v470_v47 = vrot.slane %v467_v40, 7  ;;  %v509_v49 = vrot.slane %v467_v40, 1  ;;  %s1606_s13 = smov 108  }
  0x50   : > { %v472_v48 = vrot.slane %v468_v41, 6  ;;  %v533_v50 = vrot.slane %v467_v40, 2  ;;  %v647_v38 = vrot.slane %v640_v43, %v1731_v5  ;;  %v474_v52 = vrot.slane %v469_v46, 5 }
  0x51   : > { %v628_v51 = vrot.slane %v621_v44, %v1731_v5  ;;  %v508_v53 = vrot.slane %v466_v45, 2  ;;  %v471_v42 = vsel %vm356_vm0, %v470_v47, %v466_v45  ;;  %v512_v54 = vrot.slane %v469_v46, 7 }
  0x52   : > { %v532_v55 = vrot.slane %v466_v45, 3  ;;  %v535_v56 = vrot.slane %v468_v41, 1  ;;  %648 = vrot.lane.b32.xlu1 %v647_v38, %s1590_s26  ;;  %v473_v57 = vsel %vm359_vm1, %v472_v48, %v471_v42  ;;  %v489_v59 = vrot.slane %v466_v45, 1  ;;  %s1608_s26 = smov 90  }
  0x53   : > { %629 = vrot.lane.b32.xlu0 %v628_v51, %s1591_s9  ;;  %v510_v58 = vsel %vm356_vm0, %v509_v49, %v508_v53  ;;  %v491_v60 = vrot.slane %v468_v41, 7  ;;  %v475_v61 = vsel %vm362_vm2, %v474_v52, %v473_v57  ;;  %v493_v0 = vrot.slane %v469_v46, 6 }
  0x54   : > { %v511_v62 = vsel %vm359_vm1, %v468_v41, %v510_v58  ;;  %v534_v63 = vsel %vm356_vm0, %v533_v50, %v532_v55  ;;  %v476_v1 = vpack.c.b16 %v475_v61, %v475_v61  ;;  %v490_v4 = vsel %vm356_vm0, %v467_v40, %v489_v59 }
  0x55   : > { %v513_v2 = vsel %vm362_vm2, %v512_v54, %v511_v62  ;;  %v536_v3 = vsel %vm359_vm1, %v535_v56, %v534_v63  ;;  %v492_v8 = vsel %vm359_vm1, %v491_v60, %v490_v4  ;;  %v691_v9 = vcombine.high %v1737_v23, %v1737_v23 }
  0x56   : > { %v514_v6 = vpack.c.b16 %v513_v2, %v513_v2  ;;  %v537_v7 = vsel %vm362_vm2, %v469_v46, %v536_v3  ;;  %v483_v10 = vrot.slane %v476_v1, %v1731_v5  ;;  %v494_v14 = vsel %vm362_vm2, %v493_v0, %v492_v8 }
  0x57   : > { %v538_v13 = vpack.c.b16 %v537_v7, %v537_v7  ;;  %v692_v15 = vcombine.high %v1747_v27, %v1747_v27  ;;  %v495_v19 = vpack.c.b16 %v494_v14, %v494_v14  ;;  %v693_v20 = vcombine.high %v1744_v26, %v1744_v26 }
  0x58   : > { %v521_v17 = vrot.slane %v514_v6, %v1731_v5  ;;  %v694_v22 = vcombine.high %v1755_v30, %v1755_v30  ;;  %484 = vrot.lane.b32.xlu1 %v483_v10, %s1592_s10  ;;  %v701_v24 = vrot.slane %v691_v9, %v1731_v5  ;;  %v653_v27 = vrot.slane %v1787_v11, 2 }
  0x59   : > { %v545_v23 = vrot.slane %v538_v13, %v1731_v5  ;;  %v708_v25 = vrot.slane %v692_v15, %v1731_v5  ;;  %v502_v28 = vrot.slane %v495_v19, %v1731_v5  ;;  %v715_v26 = vrot.slane %v693_v20, %v1731_v5 }
  0x5a   : > { %522 = vrot.lane.b32.xlu0 %v521_v17, %s1593_s11  ;;  %v722_v30 = vrot.slane %v694_v22, %v1731_v5  ;;  %v654_v29 = vrot.slane %v1789_v12, 1  ;;  %v723_v31 = vunpack.c.l.b16 %v701_v24  ;;  %v657_v33 = vrot.slane %v1797_v18, 7 }
  0x5b   : > { %v724_v32 = vunpack.c.l.b16 %v708_v25  ;;  %v672_v35 = vrot.slane %v1787_v11, 3  ;;  %v725_v36 = vunpack.c.l.b16 %v715_v26  ;;  %v673_v34 = vrot.slane %v1789_v12, 2 }
  0x5c   : > { %v726_v37 = vunpack.c.l.b16 %v722_v30  ;;  %v655_v21 = vsel %vm356_vm0, %v654_v29, %v653_v27  ;;  %546 = vrot.lane.b32.xlu1 %v545_v23, %s1594_s12  ;;  %v746_v39 = vrot.slane %v723_v31, 1  ;;  %v675_v41 = vrot.slane %v1794_v16, 1 }
  0x5d   : > { %v656_v40 = vsel %vm359_vm1, %v1794_v16, %v655_v21  ;;  %v727_v43 = vrot.slane %v724_v32, 7  ;;  %v748_v44 = vrot.slane %v725_v36, 7  ;;  %v674_v46 = vsel %vm356_vm0, %v673_v34, %v672_v35 }
  0x5e   : > { %503 = vrot.lane.b32.xlu0 %v502_v28, %s1595_s15  ;;  %v750_v11 = vrot.slane %v726_v37, 6  ;;  %v658_v45 = vsel %vm362_vm2, %v657_v33, %v656_v40  ;;  %v747_v12 = vsel %vm356_vm0, %v724_v32, %v746_v39  ;;  %v676_v48 = vsel %vm359_vm1, %v675_v41, %v674_v46 }
  0x5f   : > { %v659_v47 = vpack.c.b16 %v658_v45, %v658_v45  ;;  %v728_v49 = vsel %vm356_vm0, %v727_v43, %v723_v31  ;;  %v749_v50 = vsel %vm359_vm1, %v748_v44, %v747_v12  ;;  %v677_v16 = vsel %vm362_vm2, %v1797_v18, %v676_v48 }
  0x60   : > { %v729_v38 = vrot.slane %v725_v36, 6  ;;  %v731_v51 = vrot.slane %v726_v37, 5  ;;  %v751_v52 = vsel %vm362_vm2, %v750_v11, %v749_v50  ;;  %v678_v42 = vpack.c.b16 %v677_v16, %v677_v16 }
  0x61   : > { %v666_v53 = vrot.slane %v659_v47, %v1731_v5  ;;  %v770_v54 = vrot.slane %v723_v31, 2  ;;  %v752_v55 = vpack.c.b16 %v751_v52, %v751_v52  ;;  %v771_v57 = vrot.slane %v724_v32, 1  ;;  %v1231_v47 = vld [vmem:[%s1961_s3] sm:$0xff] }
  0x62   : > { %v730_v56 = vsel %vm359_vm1, %v729_v38, %v728_v49  ;;  %v774_v58 = vrot.slane %v726_v37, 7  ;;  %v685_v59 = vrot.slane %v678_v42, %v1731_v5  ;;  %v789_v18 = vrot.slane %v723_v31, 3 }
  0x63   : > { %667 = vrot.lane.b32.xlu0 %v666_v53, %s1596_s25  ;;  %v732_v60 = vsel %vm362_vm2, %v731_v51, %v730_v56  ;;  %v790_v61 = vrot.slane %v724_v32, 2  ;;  %v759_v62 = vrot.slane %v752_v55, %v1731_v5  ;;  %v772_v0 = vsel %vm356_vm0, %v771_v57, %v770_v54 }
  0x64   : > { %v733_v63 = vpack.c.b16 %v732_v60, %v732_v60  ;;  %v792_v1 = vrot.slane %v725_v36, 1  ;;  %v773_v2 = vsel %vm359_vm1, %v725_v36, %v772_v0  ;;  %v1599_v13 = vmov 0  }
  0x65   : > { %v791_v3 = vsel %vm356_vm0, %v790_v61, %v789_v18  ;;  %760 = vrot.lane.b32.xlu1 %v759_v62, %s1597_s29  ;;  %v775_v6 = vsel %vm362_vm2, %v774_v58, %v773_v2  ;;  %1173 = vmatprep.mubr.bf16.mxu0 %v1599_v13  ;;  %278 = vst.msk [vmem:[#allocation2] sm:$0xff] %vm277_vm9, %v1599_v13  ;;  %vm529_vm0 = vcmask 117762   ;;  %vm549_vm5 = vcmask 263304   ;;  %s260_s29 = smul.u32 3, %s1561_s18 }
  0x66   : > { %v740_v4 = vrot.slane %v733_v63, %v1731_v5  ;;  %v793_v7 = vsel %vm359_vm1, %v792_v1, %v791_v3  ;;  %v776_v8 = vpack.c.b16 %v775_v6, %v775_v6  ;;  %1496 = vset.pattern.permute.xlu0 %v1599_v13  ;;  %1497 = vset.pattern.permute.xlu1 %v1599_v13  ;;  %vm525_vm1 = vcmask 1039360   ;;  %vm530_vm4 = vmor %vm529_vm0, %vm528_vm15 }
  0x67   : > { %686 = vrot.lane.b32.xlu0 %v685_v59, %s1598_s14  ;;  %v794_v9 = vsel %vm362_vm2, %v726_v37, %v793_v7  ;;  %vm506_vm2 = vcmask 1017704   ;;  %vm632_vm6 = vcmask 410904   ;;  %vm651_vm7 = vcmask 558504   ;;  %p263_p0 = scmp.lt.s32.totalorder %s260_s29, 5  ;;  %s1391_s14 = smul.u32 6, %s1979_s19 }
  0x68   : > { %v795_v10 = vpack.c.b16 %v794_v9, %v794_v9  ;;  %v783_v14 = vrot.slane %v776_v8, %v1731_v5  ;;  %vm670_vm8 = vcmask 706104   ;;  %vm689_vm9 = vcmask 853704  }
  0x69   : > { %741 = vrot.lane.b32.xlu1 %v740_v4, %s1600_s30  ;;  %vm787_vm15 = vcmask 246904   ;;  %vm806_vm0 = vcmask 394504   ;;  %v1607_v12 = vmov 0.0   ;;  %s1981_s29 = smov (!%p263_p0, %s260_s29), 5 }
  0x6a   : > { %v802_v15 = vrot.slane %v795_v10, %v1731_v5  ;;  %1381 = vmatprep.subr.bf16.mxu1 %v1607_v12  ;;  %s266_s30 = sadd.s32 %s1391_s14, %s1981_s29 }
  0x6b   : > { %784 = vrot.lane.b32.xlu0 %v783_v14, %s1601_s5  ;;  %s1356_s5 = sshll.u32 %s266_s30, 3 }
  0x6d   : > { %803 = vrot.lane.b32.xlu1 %v802_v15, %s1602_s8 }
  0xbc   : > { %v411_v17 = vpop.permute.xlu1 %410 }
  0xbd   : > { %v373_v19 = vpop.permute.xlu0 %372 }
  0xbe   : > { %376 = vst.msk [vmem:[#allocation2] sm:$0x3] %vm375_vm10, %v373_v19  ;;  %vm766_vm10 = vcmask 1042408  }
  0xc0   : > { %v430_v20 = vpop.permute.xlu1 %429 }
  0xc1   : > { %v392_v22 = vpop.permute.xlu0 %391 }
  0xc2   : > { %395 = vst.msk [vmem:[#allocation2] sm:$0x3] %vm394_vm11, %v392_v22  ;;  %vm767_vm11 = vcmask 101378  }
  0xc3   : > { %414 = vst.msk [vmem:[#allocation2] sm:$0x3] %vm413_vm12, %v411_v17  ;;  %vm763_vm12 = vcmask 1022976  }
  0xc4   : > { %433 = vst.msk [vmem:[#allocation2] sm:$0x3] %vm432_vm13, %v430_v20  ;;  %v649_v23 = vpop.permute.xlu1 %648  ;;  %vm744_vm13 = vcmask 1001304  }
  0xc5   : > { %v630_v24 = vpop.permute.xlu0 %629 }
  0xca   : > { %v485_v25 = vpop.permute.xlu1 %484 }
  0xcb   : > { %488 = vst.msk [vmem:[#allocation2] sm:$0x3] %vm487_vm14, %v485_v25  ;;  %vm768_vm14 = vmor %vm767_vm11, %vm766_vm10  ;;  %vm1070_vm10 = vcmask 736256   ;;  %vm1128_vm11 = vcmask 293888  }
  0xcc   : > { %v523_v27 = vpop.permute.xlu0 %522 }
  0xcd   : > { %v524_v28 = vrot.slane %v523_v27, 6 }
  0xce   : > { %v547_v29 = vpop.permute.xlu1 %546 }
  0xcf   : > { %v526_v30 = vsel %vm525_vm1, %v524_v28, %v523_v27 }
  0xd0   : > { %v504_v26 = vpop.permute.xlu0 %503 }
  0xd1   : > { %507 = vst.msk [vmem:[#allocation2] sm:$0x3] %vm506_vm2, %v504_v26  ;;  %vm1609_vm2 = vmmov 0  }
  0xd2   : > { %531 = vst.msk [vmem:[#allocation2] sm:$0xf] %vm530_vm4, %v526_v30  ;;  %1387 = vmatprep.mubr.msk.bf16.mxu1 %vm1609_vm2, %v1607_v12  ;;  %vm915_vm4 = vcmask 900096  }
  0xd3   : > { %550 = vst.msk [vmem:[#allocation2 + $0x2] sm:$0x3] %vm549_vm5, %v547_v29  ;;  %vm977_vm5 = vcmask 883712  }
  0xd4   : > { %633 = vst.msk [vmem:[#allocation2 + $0x2] sm:$0x3] %vm632_vm6, %v630_v24  ;;  %vm1039_vm6 = vcmask 744448  }
  0xd5   : > { %v668_v31 = vpop.permute.xlu0 %667  ;;  %652 = vst.msk [vmem:[#allocation2 + $0x2] sm:$0x3] %vm651_vm7, %v649_v23  ;;  %vm852_vm7 = vcmask 1043456  }
  0xd6   : > { %671 = vst.msk [vmem:[#allocation2 + $0x2] sm:$0x3] %vm670_vm8, %v668_v31  ;;  %vm884_vm8 = vcmask 1031168  }
  0xd7   : > { %v761_v32 = vpop.permute.xlu1 %760 }
  0xd8   : > { %v762_v33 = vrot.slane %v761_v32, 6 }
  0xd9   : > { %v687_v35 = vpop.permute.xlu0 %686 }
  0xda   : > { %690 = vst.msk [vmem:[#allocation2 + $0x2] sm:$0x3] %vm689_vm9, %v687_v35  ;;  %v764_v37 = vsel %vm763_vm12, %v762_v33, %v761_v32  ;;  %vm946_vm9 = vcmask 891904  }
  0xdb   : > { %v742_v36 = vpop.permute.xlu1 %741 }
  0xdc   : > { %745 = vst.msk [vmem:[#allocation2 + $0x2] sm:$0x3] %vm744_vm13, %v742_v36 }
  0xdd   : > { %v785_v21 = vpop.permute.xlu0 %784  ;;  %769 = vst.msk [vmem:[#allocation2 + $0x2] sm:$0xf] %vm768_vm14, %v764_v37 }
  0xde   : > { %788 = vst.msk [vmem:[#allocation2 + $0x4] sm:$0x3] %vm787_vm15, %v785_v21 }
  0xdf   : > { %v804_v34 = vpop.permute.xlu1 %803 }
  0xe0   : > { %807 = vst.msk [vmem:[#allocation2 + $0x4] sm:$0x3] %vm806_vm0, %v804_v34 }
  0xe7   : > { %v808_v39 = vld [vmem:[#allocation2] sm:$0x3f] }
  0xe8   : > { %v860_v40 = vld [vmem:[#allocation2] sm:$0xff]  ;;  %1361 = vst.sshfl [vmem:[#allocation3] sm:$0xf pattern:$0x76325410] %v808_v39  ;;  %v810_v43 = vcombine.high %v808_v39, %v808_v39 }
  0xe9   : > { %v869_v41 = vrot.slane %v860_v40, %v1731_v5  ;;  %v831_v44 = vcombine.low %v860_v40, %v860_v40  ;;  %v862_v45 = vcombine.high %v860_v40, %v860_v40 }
  0xea   : > { %1362 = vst.sshfl [vmem:[#allocation3 + $0x8] sm:$0x3 pattern:$0x76325410] %v810_v43 }
  0xeb   : > { %877 = vrot.lane.b32.xlu0 %v869_v41, %s1603_s27  ;;  %848 = vrot.lane.b32.xlu1 %v869_v41, %s1593_s11  ;;  %v838_v11 = vrot.slane %v831_v44, %v1731_v5  ;;  %v876_v46 = vrot.slane %v862_v45, %v1731_v5  ;;  %v1222_v5 = vld [vmem:[%s1960_s2] sm:$0xff] }
  0xef   : > { %939 = vrot.lane.b32.xlu0 %v869_v41, %s1595_s15  ;;  %910 = vrot.lane.b32.xlu1 %v869_v41, %s1604_s28 }
  0xf3   : > { %1001 = vrot.lane.b32.xlu0 %v869_v41, %s1605_s7  ;;  %972 = vrot.lane.b32.xlu1 %v869_v41, %s1606_s13 }
  0xf7   : > { %1034 = vrot.lane.b32.xlu1 %v869_v41, %s1592_s10  ;;  %846 = vrot.lane.b32.xlu0 %v838_v11, %s1593_s11 }
  0xfb   : > { %879 = vrot.lane.b32.xlu1 %v876_v46, %s1603_s27  ;;  %908 = vrot.lane.b32.xlu0 %v838_v11, %s1604_s28  ;;  %s268_s27 = scalar_lea.vmem %s1962_s4, %s1356_s5 }
  0xff   : > { %941 = vrot.lane.b32.xlu1 %v876_v46, %s1595_s15  ;;  %970 = vrot.lane.b32.xlu0 %v838_v11, %s1606_s13 }
 0x103   : > { %1003 = vrot.lane.b32.xlu1 %v876_v46, %s1605_s7  ;;  %1032 = vrot.lane.b32.xlu0 %v838_v11, %s1592_s10 }
 0x107   : > { %1065 = vrot.lane.b32.xlu1 %v876_v46, %s1608_s26  ;;  %1063 = vrot.lane.b32.xlu0 %v869_v41, %s1608_s26 }
 0x10b   : > { %1225 = vperm.xlu0 %1496, %v1222_v5   ;;  %1234 = vperm.xlu1 %1497, %v1231_v47  }
 0x15d   : > { %v878_v48 = vpop.permute.xlu0 %877  ;;  %v849_v49 = vpop.permute.xlu1 %848 }
 0x15e   : > { %v851_v50 = vrot.slane %v849_v49, 4  ;;  %v881_v1 = vrot.slane %v878_v48, 4 }
 0x160   : > { %v855_v16 = vsel %vm525_vm1, %v849_v49, %v851_v50 }
 0x161   : > { %859 = vst [vmem:[#allocation3 + $0x8] sm:$0xc] %v855_v16  ;;  %v940_v38 = vpop.permute.xlu0 %939  ;;  %v911_v51 = vpop.permute.xlu1 %910 }
 0x162   : > { %v913_v52 = vrot.slane %v911_v51, 4  ;;  %v943_v14 = vrot.slane %v940_v38, 4 }
 0x164   : > { %v917_v53 = vsel %vm915_vm4, %v911_v51, %v913_v52 }
 0x165   : > { %921 = vst [vmem:[#allocation3 + $0x14] sm:$0xc] %v917_v53  ;;  %v1002_v42 = vpop.permute.xlu0 %1001  ;;  %v973_v54 = vpop.permute.xlu1 %972 }
 0x166   : > { %v975_v55 = vrot.slane %v973_v54, 4  ;;  %v1005_v28 = vrot.slane %v1002_v42, 4 }
 0x168   : > { %v979_v56 = vsel %vm977_vm5, %v973_v54, %v975_v55 }
 0x169   : > { %983 = vst [vmem:[#allocation3 + $0x20] sm:$0xc] %v979_v56  ;;  %v1035_v57 = vpop.permute.xlu1 %1034  ;;  %v847_v58 = vpop.permute.xlu0 %846 }
 0x16a   : > { %v1037_v59 = vrot.slane %v1035_v57, 4  ;;  %v850_v60 = vrot.slane %v847_v58, 4 }
 0x16c   : > { %v1041_v18 = vsel %vm1039_vm6, %v1035_v57, %v1037_v59  ;;  %v853_v61 = vsel %vm852_vm7, %v850_v60, %v851_v50 }
 0x16d   : > { %1045 = vst [vmem:[#allocation3 + $0x2c] sm:$0xc] %v1041_v18  ;;  %v854_v62 = vsel %vm525_vm1, %v847_v58, %v853_v61  ;;  %v880_v63 = vpop.permute.xlu1 %879  ;;  %v909_v0 = vpop.permute.xlu0 %908  ;;  %vm1008_vm1 = vcmask 752640  }
 0x16e   : > { %858 = vst [vmem:[#allocation3] sm:$0xcc] %v854_v62  ;;  %v882_v2 = vrot.slane %v880_v63, 4  ;;  %v912_v3 = vrot.slane %v909_v0, 4 }
 0x170   : > { %v883_v4 = vsel %vm852_vm7, %v881_v1, %v882_v2  ;;  %v886_v6 = vsel %vm884_vm8, %v880_v63, %v882_v2  ;;  %v914_v7 = vsel %vm852_vm7, %v912_v3, %v913_v52 }
 0x171   : > { %v885_v8 = vsel %vm884_vm8, %v878_v48, %v883_v4  ;;  %890 = vst [vmem:[#allocation3 + $0x14] sm:$0x3] %v886_v6  ;;  %v916_v9 = vsel %vm915_vm4, %v909_v0, %v914_v7  ;;  %v942_v10 = vpop.permute.xlu1 %941  ;;  %v971_v13 = vpop.permute.xlu0 %970 }
 0x172   : > { %889 = vst [vmem:[#allocation3 + $0xc] sm:$0x33] %v885_v8  ;;  %920 = vst [vmem:[#allocation3 + $0xc] sm:$0xcc] %v916_v9  ;;  %v944_v15 = vrot.slane %v942_v10, 4  ;;  %v974_v17 = vrot.slane %v971_v13, 4 }
 0x174   : > { %v945_v19 = vsel %vm852_vm7, %v943_v14, %v944_v15  ;;  %v948_v20 = vsel %vm946_vm9, %v942_v10, %v944_v15  ;;  %v976_v22 = vsel %vm852_vm7, %v974_v17, %v975_v55 }
 0x175   : > { %v947_v23 = vsel %vm946_vm9, %v940_v38, %v945_v19  ;;  %952 = vst [vmem:[#allocation3 + $0x20] sm:$0x3] %v948_v20  ;;  %v978_v24 = vsel %vm977_vm5, %v971_v13, %v976_v22  ;;  %v1004_v25 = vpop.permute.xlu1 %1003  ;;  %v1033_v27 = vpop.permute.xlu0 %1032  ;;  %v1077_v38 = vld [vmem:[%s1959_s1] sm:$0xf] }
 0x176   : > { %951 = vst [vmem:[#allocation3 + $0x18] sm:$0x33] %v947_v23  ;;  %982 = vst [vmem:[#allocation3 + $0x18] sm:$0xcc] %v978_v24  ;;  %v1006_v26 = vrot.slane %v1004_v25, 4  ;;  %v1036_v30 = vrot.slane %v1033_v27, 4 }
 0x178   : > { %v1007_v29 = vsel %vm852_vm7, %v1005_v28, %v1006_v26  ;;  %v1010_v31 = vsel %vm1008_vm1, %v1004_v25, %v1006_v26  ;;  %v1038_v32 = vsel %vm852_vm7, %v1036_v30, %v1037_v59  ;;  %v1500_v33 = vld [vmem:[#allocation3 + $0x8] ss:$12 sps:$4 sm:$0xff]  }
 0x179   : > { %v1009_v35 = vsel %vm1008_vm1, %v1002_v42, %v1007_v29  ;;  %1014 = vst [vmem:[#allocation3 + $0x2c] sm:$0x3] %v1010_v31  ;;  %v1040_v36 = vsel %vm1039_vm6, %v1033_v27, %v1038_v32  ;;  %v1066_v37 = vpop.permute.xlu1 %1065  ;;  %v1064_v21 = vpop.permute.xlu0 %1063  ;;  %v1501_v34 = vld [vmem:[#allocation3 + $0x4] ss:$12 sps:$4 sm:$0xff]   ;;  %v1503_v39 = vld [vmem:[#allocation3] ss:$12 sps:$4 sm:$0xff]   ;;  %1382 = vmatpush3.bf16.msra.mxu1 %v1500_v33 }
 0x17a   : > { %1013 = vst [vmem:[#allocation3 + $0x24] sm:$0x33] %v1009_v35  ;;  %1044 = vst [vmem:[#allocation3 + $0x24] sm:$0xcc] %v1040_v36  ;;  %v1068_v40 = vrot.slane %v1066_v37, 4  ;;  %v1067_v41 = vrot.slane %v1064_v21, 4  ;;  %1141 = vmatprep.subr.bf16.mxu0 %v1501_v34  ;;  %1383 = vmatprep.subr.bf16.mxu1 %v1607_v12 }
 0x17b   : > { %1142 = vmatpush1.bf16.msra.mxu0 %v1503_v39 }
 0x17c   : > { %v1072_v43 = vsel %vm1070_vm10, %v1066_v37, %v1068_v40  ;;  %v1069_v44 = vsel %vm852_vm7, %v1067_v41, %v1068_v40 }
 0x17d   : > { %1076 = vst [vmem:[#allocation3 + $0x38] sm:$0x3] %v1072_v43  ;;  %v1071_v11 = vsel %vm1070_vm10, %v1064_v21, %v1069_v44 }
 0x17e   : > { %1075 = vst [vmem:[#allocation3 + $0x30] sm:$0x33] %v1071_v11 }
 0x180   : > { %v1504_v45 = vld [vmem:[#allocation3 + $0x20] ss:$12 sps:$4 sm:$0xff]  }
 0x181   : > { %v1505_v46 = vld [vmem:[#allocation3 + $0x1c] ss:$12 sps:$4 sm:$0xff]   ;;  %v1507_v5 = vld [vmem:[#allocation3 + $0x18] ss:$12 sps:$4 sm:$0xff]   ;;  %1384 = vmatpush3.bf16.msra.mxu1 %v1504_v45 }
 0x182   : > { %1143 = vmatprep.subr.bf16.mxu0 %v1505_v46  ;;  %1385 = vmatprep.subr.bf16.mxu1 %v1607_v12 }
 0x183   : > { %1144 = vmatpush1.bf16.msra.mxu0 %v1507_v5 }
 0x184   : > { %v1509_v47 = vld [vmem:[#allocation3 + $0x38] ss:$0 sps:$4 sm:$0x33]  }
 0x185   : > { %v1086_v48 = vld [vmem:[#allocation3 + $0x30] sm:$0x33]  ;;  %v1139_v50 = vsel %vm271_vm3, %v1509_v47, 0 }
 0x186   : > { %v1370_v49 = vcombine.high %v1086_v48, %v1086_v48  ;;  %v1369_v16 = vcombine.low %v1086_v48, %v1086_v48  ;;  %1386 = vmatpush3.bf16.msra.mxu1 %v1139_v50 }
 0x188   : > { %1372 = vmatprep.subr.msk.bf16.mxu0 %vm271_vm3, %v1370_v49  ;;  %v1133_v51 = vsel %vm271_vm3, %v1369_v16, 0 }
 0x189   : > { %1146 = vmatpush1.bf16.msra.mxu0 %v1133_v51  ;;  %1388 = vmatmul.mubr.msk.bf16.vlgmr.msra.gmra.mrb[0].mxu1 %vm1128_vm11, %v1077_v38 }
 0x18a   : > { %v1226_v12 = vpop.permute.xlu0 %1225  ;;  %v1235_v53 = vpop.permute.xlu1 %1234 }
 0x18c   : > { %1373 = vmatmul.mubr.msk.bf16.vlgmr.msra.gmra.mrb[0].mxu0 %vm1128_vm11, %v1077_v38 }
 0x25c   : > { %v1216_v52 = vpop.f32.mrb[0].mxu1 }
 0x25d   : > { %v1230_v42 = vmul.f32 %v1226_v12, %v1216_v52  ;;  %v1389_v54 = vpop.f32.mrb[1].mxu1 }
 0x25e   : > { %v1219_v56 = vpop.f32.mrb[2].mxu1 }
 0x25f   : > { %v1175_v55 = vpop.f32.mrb[0].mxu0  ;;  %v1239_v59 = vadd.f32 %v1235_v53, %v1230_v42  ;;  %v1390_v60 = vpop.f32.mrb[3].mxu1 }
 0x260   : > { %v1228_v57 = vmul.f32 %v1226_v12, %v1175_v55  ;;  %v1177_v58 = vpop.f32.mrb[1].mxu0 }
 0x261   : > { %v1229_v18 = vmul.f32 %v1226_v12, %v1177_v58  ;;  %v1179_v61 = vpop.f32.mrb[2].mxu0  ;;  %v1242_v63 = vmax.f32 %v1239_v59, 0.0 }
 0x262   : > { %v1237_v62 = vadd.f32 %v1235_v53, %v1228_v57  ;;  %v1180_v0 = vpop.f32.mrb[3].mxu0 }
 0x263   : > { %v1238_v1 = vadd.f32 %v1235_v53, %v1229_v18  ;;  %1245 = vst [vmem:[%s268_s27 + $0x10] sm:$0xff] %v1242_v63 }
 0x264   : > { %v1240_v2 = vmax.f32 %v1237_v62, 0.0 }
 0x265   : > { %v1241_v3 = vmax.f32 %v1238_v1, 0.0 }
 0x266   : > { %1243 = vst [vmem:[%s268_s27] sm:$0xff] %v1240_v2 }
 0x267   : > { %1244 = vst [vmem:[%s268_s27 + $0x8] sm:$0xff] %v1241_v3 }
 0x268 PF: > { %s17_s22 = sadd.s32 1, %s1577_s22   ;;  %s1965_s15 = smov %s1553_s16 }
 0x269   : > { %p14_p1 = scmp.ge.s32.totalorder %s17_s22, 6   ;;  %s1966_s16 = smov %s1557_s17 }
 0x26a   : > { %s1967_s17 = smov %s1699_s6  ;;  %s1968_s18 = smov %s1569_s20 }
 0x26b   : > { %s1969_s19 = smov %s1573_s21  ;;  %s1970_s20 = smov %s1973_s23 }
 0x26c   : > { %s1971_s21 = smov %s1977_s24  ;;  %16 = sbr.rel (!%p14_p1) target bundleno = 5 (0x5), region = 81 }
 0x273   :  { %1276 = vsyncpa [#allocation5], 1 }
 0x274   :  { %1278 = vsyncpa [#allocation5 + $0x1], 1 }

</bundles_post_ra>
